<compile_context>
chip_gen: v7x
topology: tpu7x:2x2x1
jax: 0.10.0
libtpu: 0.0.40
codegen_flags: <defaults>
</compile_context>

<pallas_src>
import jax
import jax.numpy as jnp
from jax.experimental import pallas as pl
from jax.experimental.pallas import tpu as pltpu


_MiB = 1024 * 1024


def _round_up(x, m):
    return (x + m - 1) // m * m


def _vmem_capacity_bytes():
    """Physical VMEM per TensorCore; conservative 64 MiB (v7x) fallback."""
    try:
        info = pltpu.get_tpu_info()
        cap = int(getattr(info, "vmem_capacity_bytes", 0) or 0)
        if cap > 0:
            return cap
    except Exception:
        pass
    return 64 * _MiB


def _patch_embed_kernel(x_ref, w_ref, b_ref, o_ref):
    # x_ref: (tm, K) compute dtype; w_ref: (K, N) compute dtype (VMEM-resident);
    # b_ref: (1, N) f32; o_ref: (tm, N) out dtype.
    acc = jnp.dot(x_ref[...], w_ref[...], preferred_element_type=jnp.float32)
    o_ref[...] = (acc + b_ref[...]).astype(o_ref.dtype)


def _pick_m_tiling(M, row_align, target_tm):
    """Return (tm, grid_m, M_pad); prefer a tm that divides the aligned M."""
    M_al = _round_up(M, row_align)
    target_tm = max(row_align, min(target_tm, M_al) // row_align * row_align)
    if M_al >= 256:
        # At least two grid steps so the parallel M axis shards across both
        # TensorCores on v7x (one extra ~0.35us step is noise elsewhere).
        target_tm = min(target_tm, _round_up(pl.cdiv(M_al, 2), row_align))
    tm = target_tm
    cand = target_tm
    lo = max(row_align, target_tm // 2)
    while cand >= lo:
        if M_al % cand == 0:
            tm = cand
            break
        cand -= row_align
    grid_m = pl.cdiv(M_al, tm)
    return tm, grid_m, tm * grid_m


def patch_embed(x, weight, bias, patch_size, compute_dtype=jnp.bfloat16,
                out_dtype=None):
    """ViT patch embedding == proj(x).flatten(2).transpose(1, 2).

    x:      (B, C, H, W)  NCHW, as in the PyTorch module.
    weight: (E, C, p, p)  nn.Conv2d(C, E, p, stride=p) weight.
    bias:   (E,)
    Returns (B, num_patches, E).
    """
    B, C, H, W = x.shape
    p = patch_size
    E = weight.shape[0]
    gh, gw = H // p, W // p
    num_patches = gh * gw

    odt = jnp.dtype(out_dtype) if out_dtype is not None else jnp.dtype(x.dtype)
    cdt = jnp.dtype(compute_dtype) if compute_dtype is not None else jnp.dtype(x.dtype)

    # --- glue: im2col (non-overlapping patches) -> (M, K), in compute dtype --
    # Cast first so that, even if XLA materializes the transposed copy, it is
    # half-width.
    # TODO(synk): verify in post-jit HLO that this transpose fuses into the
    # pallas_call input DMA; if it materializes, express the patch gather
    # in-kernel via a BlockSpec over the original NCHW x.
    xp = x.astype(cdt).reshape(B, C, gh, p, gw, p)
    xp = jnp.transpose(xp, (0, 2, 4, 1, 3, 5))                # (B, gh, gw, C, p, p)
    xp = xp.reshape(B * num_patches, C * p * p)               # (M, K)
    M, K = xp.shape

    in_bytes = cdt.itemsize
    out_bytes = odt.itemsize

    # --- lane-dense / MXU-friendly padding along K and N ---------------------
    K_pad = _round_up(K, 128)
    N_pad = _round_up(E, 128)

    # conv weight (E, C, p, p) -> (K_pad, N_pad); bias -> (1, N_pad) in f32
    w2d = weight.reshape(E, K).T.astype(cdt)
    b2d = bias.astype(jnp.float32).reshape(1, E)
    if K_pad != K:
        xp = jnp.pad(xp, ((0, 0), (0, K_pad - K)))
        w2d = jnp.pad(w2d, ((0, K_pad - K), (0, 0)))
    if N_pad != E:
        w2d = jnp.pad(w2d, ((0, 0), (0, N_pad - E)))
        b2d = jnp.pad(b2d, ((0, 0), (0, N_pad - E)))

    # --- per-chip VMEM budget & M tiling (weight resident, M streamed) -------
    cap = _vmem_capacity_bytes()
    if cap <= 64 * _MiB:                       # v7x-class: 64 MiB/TC, keep headroom
        budget = cap - 12 * _MiB
        chip_target_tm = 2048
    else:                                      # v5e / v6e: 128 MiB physical
        budget = min(cap - 24 * _MiB, 104 * _MiB)
        chip_target_tm = 4096

    row_align = 8 if cdt.itemsize >= 4 else 16               # f32 -> 8, bf16 -> 16
    resident = 2 * K_pad * N_pad * in_bytes + 2 * N_pad * 4  # weight + bias (dbl-buf)
    per_row = 2 * (K_pad * in_bytes + N_pad * out_bytes)     # dbl-buffered in/out row
    # TODO(synk): if `resident` ever exceeds the budget (enormous E*K), fall
    # back to tiling N as well; never happens at ViT sizes.
    tm_budget = max(row_align, (budget - resident) // per_row // row_align * row_align)
    tm, grid_m, M_pad = _pick_m_tiling(M, row_align, min(chip_target_tm, tm_budget))

    if M_pad != M:
        xp = jnp.pad(xp, ((0, M_pad - M), (0, 0)))

    vmem_needed = resident + per_row * tm
    vmem_limit = int(min(cap, max(vmem_needed + 16 * _MiB, 32 * _MiB)))

    cost = pl.CostEstimate(
        flops=2 * M_pad * K_pad * N_pad,
        transcendentals=0,
        bytes_accessed=(M_pad * K_pad + K_pad * N_pad) * in_bytes
        + N_pad * 4
        + M_pad * N_pad * out_bytes,
    )

    out = pl.pallas_call(
        _patch_embed_kernel,
        out_shape=jax.ShapeDtypeStruct((M_pad, N_pad), odt),
        grid_spec=pltpu.PrefetchScalarGridSpec(
            num_scalar_prefetch=0,
            grid=(grid_m,),
            in_specs=[
                pl.BlockSpec((tm, K_pad), lambda i: (i, 0)),
                pl.BlockSpec((K_pad, N_pad), lambda i: (0, 0)),  # resident: DMA'd once
                pl.BlockSpec((1, N_pad), lambda i: (0, 0)),      # resident bias
            ],
            out_specs=pl.BlockSpec((tm, N_pad), lambda i: (i, 0)),
        ),
        compiler_params=pltpu.CompilerParams(
            dimension_semantics=("parallel",),
            vmem_limit_bytes=vmem_limit,
            allow_input_fusion=[True, False, False],
        ),
        cost_estimate=cost,
    )(xp, w2d, b2d)

    return out[:M, :E].reshape(B, num_patches, E)


if __name__ == "__main__":
    key = jax.random.PRNGKey(0)
    kx, kw, kb = jax.random.split(key, 3)

    def _ref(x, weight, bias, p):
        E = weight.shape[0]
        r = jax.lax.conv_general_dilated(
            x, weight, window_strides=(p, p), padding="VALID",
            dimension_numbers=("NCHW", "OIHW", "NCHW"),
        ) + bias.reshape(1, E, 1, 1)
        return r.reshape(x.shape[0], E, -1).transpose(0, 2, 1)

    pe = jax.jit(patch_embed,
                 static_argnames=("patch_size", "compute_dtype", "out_dtype"))

    # Small shapes consistent with the module's forward:
    #   B=2, C=4, H=W=16, patch_size=8, embed_dim=32 -> num_patches=4
    B, C, H, W, p, E = 2, 4, 16, 16, 8, 32
    x = jax.random.normal(kx, (B, C, H, W), dtype=jnp.float32)
    w = jax.random.normal(kw, (E, C, p, p), dtype=jnp.float32) * 0.02
    b = jax.random.normal(kb, (E,), dtype=jnp.float32) * 0.02

    ref = _ref(x, w, b, p)
    num_patches = (H // p) * (W // p)

    # Default path: bf16 compute (f32 accumulation), f32 output.
    out = jax.block_until_ready(pe(x, w, b, patch_size=p))
    assert out.shape == (B, num_patches, E)
    assert out.dtype == x.dtype
    assert jnp.allclose(out, ref, atol=5e-2, rtol=5e-2)

    # Strict-numerics path: f32 compute matches the conv reference tightly.
    out_f32 = jax.block_until_ready(
        pe(x, w, b, patch_size=p, compute_dtype=jnp.float32))
    assert jnp.allclose(out_f32, ref, atol=1e-4, rtol=1e-4)

    # Slightly larger case exercising a multi-step (megacore-shardable) grid
    # and the padding-free tiling path: M = 2 * 256 = 512 rows.
    B2, H2, W2, p2, E2 = 2, 128, 128, 8, 128
    x2 = jax.random.normal(kx, (B2, C, H2, W2), dtype=jnp.float32)
    w2 = jax.random.normal(kw, (E2, C, p2, p2), dtype=jnp.float32) * 0.02
    b2 = jax.random.normal(kb, (E2,), dtype=jnp.float32) * 0.02
    out2 = jax.block_until_ready(pe(x2, w2, b2, patch_size=p2))
    ref2 = _ref(x2, w2, b2, p2)
    assert out2.shape == (B2, (H2 // p2) * (W2 // p2), E2)
    assert jnp.allclose(out2, ref2, atol=5e-2, rtol=5e-2)

    print("KERNEL_OK")
</pallas_src>

<mosaic_0001>
module attributes {stable_mosaic.version = 11 : i64} {
  func.func @_patch_embed_kernel(%arg0: i32, %arg1: memref<16x256xbf16, #tpu.memory_space<vmem>>, %arg2: memref<256x128xbf16, #tpu.memory_space<vmem>>, %arg3: memref<1x128xf32, #tpu.memory_space<vmem>>, %arg4: memref<16x128xf32, #tpu.memory_space<vmem>>) attributes {dimension_semantics = [#tpu.dimension_semantics<parallel>], iteration_bounds = array<i64: 1>, scalar_prefetch = 0 : i64, scratch_operands = 0 : i64, tpu.core_type = #tpu.core_type<tc>, window_params = [{transform_indices = @transform_0, window_bounds = array<i64: 16, 256>}, {pipeline_mode = #tpu.pipeline_mode<synchronous>, transform_indices = @transform_1, window_bounds = array<i64: 256, 128>}, {pipeline_mode = #tpu.pipeline_mode<synchronous>, transform_indices = @transform_2, window_bounds = array<i64: 1, 128>}, {transform_indices = @transform_3, window_bounds = array<i64: 16, 128>}]} {
    %c0 = arith.constant 0 : index
    %c0_0 = arith.constant 0 : index
    %0 = vector.load %arg1[%c0, %c0_0] : memref<16x256xbf16, #tpu.memory_space<vmem>>, vector<16x256xbf16>
    %c0_1 = arith.constant 0 : index
    %c0_2 = arith.constant 0 : index
    %1 = vector.load %arg2[%c0_1, %c0_2] : memref<256x128xbf16, #tpu.memory_space<vmem>>, vector<256x128xbf16>
    %cst = arith.constant dense<0.000000e+00> : vector<16x128xf32>
    %2 = tpu.matmul %0, %1, %cst {dimension_numbers = #tpu.dot_dimension_numbers<[1], [0], [0], [1], [0, 0, 1, 1], [], []>} : vector<16x256xbf16>, vector<256x128xbf16>, vector<16x128xf32> -> vector<16x128xf32>
    %c0_3 = arith.constant 0 : index
    %c0_4 = arith.constant 0 : index
    %3 = vector.load %arg3[%c0_3, %c0_4] : memref<1x128xf32, #tpu.memory_space<vmem>>, vector<1x128xf32>
    %4 = vector.broadcast %3 : vector<1x128xf32> to vector<16x128xf32>
    %5 = arith.addf %2, %4 : vector<16x128xf32>
    %c0_5 = arith.constant 0 : index
    %c0_6 = arith.constant 0 : index
    %6 = vector.load %arg4[%c0_5, %c0_6] : memref<16x128xf32, #tpu.memory_space<vmem>>, vector<16x128xf32>
    tpu.vector_store %arg4[%c0_5, %c0_6], %5 {strides = array<i32>} : memref<16x128xf32, #tpu.memory_space<vmem>>, vector<16x128xf32>,
    return
  }
  func.func @transform_0(%arg0: i32) -> (i32, i32) {
    %c0_i32 = arith.constant 0 : i32
    %c0_i32_0 = arith.constant 0 : i32
    return %arg0, %c0_i32 : i32, i32
  }
  func.func @transform_1(%arg0: i32) -> (i32, i32) {
    %c0_i32 = arith.constant 0 : i32
    %c0_i32_0 = arith.constant 0 : i32
    %c0_i32_1 = arith.constant 0 : i32
    return %c0_i32, %c0_i32_0 : i32, i32
  }
  func.func @transform_2(%arg0: i32) -> (i32, i32) {
    %c0_i32 = arith.constant 0 : i32
    %c0_i32_0 = arith.constant 0 : i32
    %c0_i32_1 = arith.constant 0 : i32
    return %c0_i32, %c0_i32_0 : i32, i32
  }
  func.func @transform_3(%arg0: i32) -> (i32, i32) {
    %c0_i32 = arith.constant 0 : i32
    %c0_i32_0 = arith.constant 0 : i32
    return %arg0, %c0_i32 : i32, i32
  }
}

</mosaic_0001>

<bundles_post_ra>
// kernel: patch_embed.2
= control target key start
LH: loop header
LB: loop body
LE: loop exit
PB: predicated region body
PF: predicated region fallthrough
CT: control target
= control target key end

     0   :  { %s406_s0 = inlined_call_operand.vmem [shape: bf16[256,128], index: 0, kind: input, shape index: {}]   ;;  %s407_s1 = inlined_call_operand.vmem [shape: f32[1,128], index: 1, kind: input, shape index: {}]   ;;  %s408_s2 = inlined_call_operand.vmem [shape: bf16[8,256], index: 2, kind: input, shape index: {}]   ;;  %s409_s3 = inlined_call_operand.<no memory space> [shape: bf16[], index: 3, kind: input, shape index: {}]   ;;  %s410_s4 = inlined_call_operand.vmem [shape: f32[16,128], index: 4, kind: output, shape index: {}]  }
   0x1   :  { %v9_v0 = vstv %s409_s3 }
   0x2   :  { %v10_v1 = vunpack.i.l.bf16 %v9_v0 }
   0x3   :  { %v302_v2 = vld [vmem:[%s406_s0 + $0x40] sm:$0xff]   ;;  %v304_v5 = vld [vmem:[%s406_s0 + $0x48] sm:$0xff]   ;;  %v306_v7 = vld [vmem:[%s406_s0 + $0x50] sm:$0xff]  }
   0x4   :  { %v278_v3 = vpack.c.bf16 %v10_v1, %v10_v1  ;;  %v303_v4 = vld [vmem:[%s406_s0] sm:$0xff]   ;;  %280 = vmatprep.subr.bf16.mxu0 %v302_v2  ;;  %v305_v6 = vld [vmem:[%s406_s0 + $0x8] sm:$0xff]   ;;  %v307_v8 = vld [vmem:[%s406_s0 + $0x10] sm:$0xff]  }
   0x5   :  { %281 = vmatpush3.bf16.msra.mxu0 %v303_v4  ;;  %v308_v9 = vld [vmem:[%s406_s0 + $0x58] sm:$0xff]   ;;  %v310_v11 = vld [vmem:[%s406_s0 + $0x60] sm:$0xff]   ;;  %v312_v13 = vld [vmem:[%s406_s0 + $0x68] sm:$0xff]  }
   0x6   :  { %282 = vmatprep.subr.bf16.mxu0 %v304_v5  ;;  %v309_v10 = vld [vmem:[%s406_s0 + $0x18] sm:$0xff]   ;;  %v311_v12 = vld [vmem:[%s406_s0 + $0x20] sm:$0xff]   ;;  %v313_v15 = vld [vmem:[%s406_s0 + $0x28] sm:$0xff]  }
   0x7   :  { %v29_v14 = vld [vmem:[%s408_s2] sm:$0xff]   ;;  %v314_v16 = vld [vmem:[%s406_s0 + $0x70] sm:$0xff]   ;;  %v316_v18 = vld [vmem:[%s406_s0 + $0x78] sm:$0xff]  }
   0x8   :  { %34 = vst [vmem:[#allocation7] sm:$0xff] %v29_v14   ;;  %v315_v17 = vld [vmem:[%s406_s0 + $0x30] sm:$0xff]   ;;  %v317_v21 = vld [vmem:[%s406_s0 + $0x38] sm:$0xff]   ;;  %v256_v24 = vld [vmem:[%s407_s1] ss:$0 sm:$0xff] }
   0x9   :  { %283 = vmatpush3.bf16.msra.mxu0 %v305_v6 }
   0xa   :  { %284 = vmatprep.subr.bf16.mxu0 %v306_v7 }
   0xd   :  { %285 = vmatpush3.bf16.msra.mxu0 %v307_v8 }
   0xe   :  { %286 = vmatprep.subr.bf16.mxu0 %v308_v9 }
   0xf   :  { %v61_v19 = vld [vmem:[#allocation7] sm:$0xff] }
  0x10   :  { %v258_v20 = vcombine.high %v61_v19, %v278_v3  ;;  %v257_v22 = vcombine.low %v61_v19, %v278_v3 }
  0x11   :  { %287 = vmatpush3.bf16.msra.mxu0 %v309_v10 }
  0x12   :  { %288 = vmatprep.subr.bf16.mxu0 %v310_v11  ;;  %240 = vmatprep.mubr.bf16.mxu0 %v258_v20 }
  0x15   :  { %289 = vmatpush3.bf16.msra.mxu0 %v311_v12 }
  0x16   :  { %290 = vmatprep.subr.bf16.mxu0 %v312_v13 }
  0x19   :  { %291 = vmatpush3.bf16.msra.mxu0 %v313_v15 }
  0x1a   :  { %292 = vmatprep.subr.bf16.mxu0 %v314_v16 }
  0x1d   :  { %293 = vmatpush3.bf16.msra.mxu0 %v315_v17 }
  0x1e   :  { %294 = vmatprep.subr.bf16.mxu0 %v316_v18 }
  0x21   :  { %295 = vmatpush3.bf16.msra.mxu0 %v317_v21 }
  0x24   :  { %241 = vmatmul.mubr.bf16.vlgmr.msra.gmra.mrb[0].mxu0 %v257_v22 }
  0xf7   :  { %v296_v23 = vpop.f32.mrb[0].mxu0 }
  0xf8   :  { %v297_v25 = vpop.f32.mrb[1].mxu0 }
  0xf9   :  { %v298_v26 = vadd.f32 %v297_v25, %v296_v23  ;;  %v299_v27 = vpop.f32.mrb[2].mxu0 }
  0xfa   :  { %v300_v28 = vpop.f32.mrb[3].mxu0 }
  0xfb   :  { %v243_v29 = vadd.f32 %v298_v26, %v256_v24  ;;  %v301_v30 = vadd.f32 %v300_v28, %v299_v27 }
  0xfd   :  { %249 = vst [vmem:[%s410_s4] sm:$0xff] %v243_v29  ;;  %v246_v31 = vadd.f32 %v301_v30, %v256_v24 }
  0xff   :  { %250 = vst [vmem:[%s410_s4 + $0x8] sm:$0xff] %v246_v31 }

</bundles_post_ra>
